<compile_context>
chip_gen: v7x
topology: tpu7x:2x2x1
jax: 0.10.0
libtpu: 0.0.40
codegen_flags: <defaults>
</compile_context>

<pallas_src>
import math

import jax
import jax.numpy as jnp
import numpy as np
from jax import lax
from jax.experimental import pallas as pl
from jax.experimental.pallas import tpu as pltpu

# ----------------------------- static config --------------------------------
B = 8                   # batch of independent graphs (grid axis, "parallel")
N = 16                  # nodes per graph
IN_CHANNELS = 8
OUT_CHANNELS = 8        # must equal IN_CHANNELS and NUM_HEADS (see NOTE)
NUM_HEADS = 8
POWER_K = 2             # args.power_k
CURV_K = 1.0            # Lorentz curvature manifold.k
D = OUT_CHANNELS
H = NUM_HEADS
HD = H * D              # 64
CIN1 = IN_CHANNELS + 1  # 9: +1 Lorentz time coordinate
CP = 16                 # CIN1 zero-padded to a sublane-aligned width


# ------------------------------ Pallas kernel --------------------------------
def _transconv_kernel(x2_ref, wf_ref, bf_ref, bd2_ref, bd2t_ref, bd1_ref,
                      wm_ref, bm_ref, ns_ref, k_ref, t_ref, s_ref):
    f32 = jnp.float32
    inv_ns = ns_ref[0, 0]          # 1 / |norm_scale| (hoisted to the wrapper)
    kc = k_ref[0, 0]               # curvature k

    # Single fused projection: LHS is [xq_pad | xs_pad], weight is block-
    # diagonal so columns come out as [q | k | vsw | vsw] (vsw duplicated so
    # the phi_k * v product below stays lane-aligned with the packed slab).
    proj = jnp.dot(x2_ref[...], wf_ref[...],
                   preferred_element_type=f32) + bf_ref[...]          # [N, 4*HD]
    qk = proj[:, :2 * HD]          # [N,128] packed q||k  (lane-tile aligned)
    v2 = proj[:, 2 * HD:]          # [N,128] = [vsw | vsw]
    vsw = proj[:, 2 * HD:3 * HD]   # [N, 64] vsw[n, h*D+d] = v[n, d, h]

    # phi = fp((relu(.) + 1e-6) / |norm_scale|) on the packed 128-lane slab.
    x = (jnp.maximum(qk, 0.0) + 1e-6) * inv_ns
    xp = x * x if POWER_K == 2 else x ** POWER_K
    # per-head squared norms via MXU block sums (bd2: [128, 2H] block-diag)
    ssq = jnp.dot(xp, bd2_ref[...], preferred_element_type=f32)       # ||x||^2
    ssq_p = jnp.dot(xp * xp, bd2_ref[...], preferred_element_type=f32)  # ||x^p||^2
    ratio = jnp.sqrt(ssq) * lax.rsqrt(ssq_p)                          # ||x||/||x^p||
    phi = jnp.dot(ratio, bd2t_ref[...],
                  preferred_element_type=f32) * xp                    # [N,128]=[phi_q|phi_k]

    # Column sums over nodes; the k-half of phi pairs with vsw in v2.
    s1 = jnp.sum(phi * v2, axis=0, keepdims=True)   # [1,128]; lanes 64: = ktv
    s2 = jnp.sum(phi, axis=0, keepdims=True)        # [1,128]; lanes 64: = ksum
    ktv = s1[:, HD:]                                # [1,64]
    ksum = s2[:, HD:]                               # [1,64]
    phi_q = phi[:, :HD]                             # [N,64]

    bd1 = bd1_ref[...]                              # [64, H] per-head block sum
    numer = jnp.dot(phi_q * ktv, bd1, preferred_element_type=f32)     # [N,H]
    denom = jnp.dot(phi_q * ksum, bd1, preferred_element_type=f32)    # [N,H]
    # Exact divide kept: approx reciprocal error is borderline vs 1e-4 tol.
    attn = numer / (denom + 1e-6)

    # v.mean(dim=1) over heads, then v_map_mlp.
    v_mean = jnp.dot(vsw, bd1, preferred_element_type=f32) * (1.0 / H)
    v_map = jnp.dot(v_mean, wm_ref[...], preferred_element_type=f32) + bm_ref[...]

    s = attn + v_map                                                  # [N, D]
    t = jnp.sqrt(jnp.sum(s * s, axis=-1, keepdims=True) + kc)         # time coord
    # manifold.projx is idempotent on [t, s]; manifold.mid_point of a single
    # point has Lorentz inner product exactly -k, so its rescale is 1 -> dropped.
    t_ref[...] = t
    s_ref[...] = s


# ------------------------------- wrapper --------------------------------------
def trans_conv_layer(xq, xs, params):
    (wf, bf, bd2, bd2t, bd1, wm, bm, inv_ns, kc) = params
    batch = xq.shape[0]

    def pad_c(a):  # zero-pad feature dim CIN1 -> CP (pad rows of wf are zero)
        return jnp.pad(a, ((0, 0), (0, 0), (0, CP - a.shape[-1])))

    x2 = jnp.concatenate([pad_c(xq), pad_c(xs)], axis=-1)   # [B, N, 2*CP]

    def full(arr):
        nd = arr.ndim
        return pl.BlockSpec(arr.shape, lambda b, _nd=nd: (0,) * _nd)

    def smem(arr):
        nd = arr.ndim
        return pl.BlockSpec(arr.shape, lambda b, _nd=nd: (0,) * _nd,
                            memory_space=pltpu.MemorySpace.SMEM)

    t_out, s_out = pl.pallas_call(
        _transconv_kernel,
        grid=(batch,),
        in_specs=[
            pl.BlockSpec((None, N, 2 * CP), lambda b: (b, 0, 0)),
            full(wf), full(bf), full(bd2), full(bd2t), full(bd1),
            full(wm), full(bm), smem(inv_ns), smem(kc),
        ],
        out_specs=(
            pl.BlockSpec((None, N, 1), lambda b: (b, 0, 0)),
            pl.BlockSpec((None, N, D), lambda b: (b, 0, 0)),
        ),
        out_shape=(
            jax.ShapeDtypeStruct((batch, N, 1), jnp.float32),
            jax.ShapeDtypeStruct((batch, N, D), jnp.float32),
        ),
        compiler_params=pltpu.CompilerParams(
            dimension_semantics=("parallel",)),
    )(x2, wf, bf, bd2, bd2t, bd1, wm, bm, inv_ns, kc)

    return jnp.concatenate([t_out, s_out], axis=-1)         # [B, N, D+1]


# ------------------------- pure-JAX reference (torch semantics) --------------
def reference(xq, xs, wq3, bq3, wk3, bk3, wv3, bv3, wm, bm, norm_scale, kc):
    def hyplinear(x, w, b):
        xsp = x @ w + b
        xt = jnp.sqrt((xsp ** 2).sum(-1, keepdims=True) + kc)
        return jnp.concatenate([xt, xsp], -1)

    q = jnp.stack([hyplinear(xq, wq3[i], bq3[i]) for i in range(H)], axis=1)
    kk = jnp.stack([hyplinear(xs, wk3[i], bk3[i]) for i in range(H)], axis=1)
    v = jnp.stack([hyplinear(xs, wv3[i], bv3[i]) for i in range(H)], axis=1)
    qs, ks, vs = q[..., 1:], kk[..., 1:], v[..., 1:]

    def fp(x, p=POWER_K):
        xp = x ** p
        nx = jnp.linalg.norm(x, axis=-1, keepdims=True)
        nxp = jnp.linalg.norm(xp, axis=-1, keepdims=True)
        return nx / nxp * xp

    phi_q = fp((jax.nn.relu(qs) + 1e-6) / jnp.abs(norm_scale))
    phi_k = fp((jax.nn.relu(ks) + 1e-6) / jnp.abs(norm_scale))
    ktv = jnp.einsum('nhd,ndh->hd', phi_k, vs)
    numer = jnp.einsum('nhd,hd->nh', phi_q, ktv)
    denom = jnp.einsum('nhd,hd->nh', phi_q, jnp.einsum('nhd->hd', phi_k))
    attn = numer / (denom + 1e-6)
    vm = vs.mean(axis=1) @ wm + bm
    attn = (attn + vm)[:, None, :]
    t = jnp.sqrt((attn ** 2).sum(-1, keepdims=True) + kc)
    out = jnp.concatenate([t, attn], -1)
    sp = out[..., 1:]                                   # projx
    out = jnp.concatenate([jnp.sqrt(kc + (sp ** 2).sum(-1, keepdims=True)), sp], -1)
    ave = out.mean(axis=-2)                             # mid_point
    inner = -(ave[..., :1] ** 2) + (ave[..., 1:] ** 2).sum(-1, keepdims=True)
    dn = jnp.sqrt(jnp.maximum(jnp.abs(inner), 1e-8))
    return jnp.sqrt(kc) * ave / dn


# -------------------------------- main ----------------------------------------
if __name__ == "__main__":
    key = jax.random.PRNGKey(0)
    keys = jax.random.split(key, 12)
    f32 = jnp.float32
    sc = 1.0 / math.sqrt(CIN1)

    # Per-head HypLinear weights (stored as right-multiply [CIN1, D]).
    wq3 = jax.random.normal(keys[0], (H, CIN1, D), f32) * sc
    wk3 = jax.random.normal(keys[1], (H, CIN1, D), f32) * sc
    wv3 = jax.random.normal(keys[2], (H, CIN1, D), f32) * sc
    bq3 = jax.random.normal(keys[3], (H, D), f32) * 0.1
    bk3 = jax.random.normal(keys[4], (H, D), f32) * 0.1
    bv3 = jax.random.normal(keys[5], (H, D), f32) * 0.1
    wm = jax.random.normal(keys[6], (D, D), f32) * (1.0 / math.sqrt(D))
    bm = jax.random.normal(keys[7], (1, D), f32) * 0.1
    norm_scale = -0.8  # exercises .abs()

    # Inputs: batch of valid Lorentz points [B, N, in_channels + 1].
    xq_sp = jax.random.normal(keys[8], (B, N, IN_CHANNELS), f32)
    xs_sp = jax.random.normal(keys[9], (B, N, IN_CHANNELS), f32)
    xq = jnp.concatenate(
        [jnp.sqrt(CURV_K + (xq_sp ** 2).sum(-1, keepdims=True)), xq_sp], -1)
    xs = jnp.concatenate(
        [jnp.sqrt(CURV_K + (xs_sp ** 2).sum(-1, keepdims=True)), xs_sp], -1)

    # ---- host-side glue: flatten heads, build the fused / padded weight ----
    wq_all = np.asarray(jnp.transpose(wq3, (1, 0, 2)).reshape(CIN1, HD))   # col h*D+d
    wk_all = np.asarray(jnp.transpose(wk3, (1, 0, 2)).reshape(CIN1, HD))
    wv_perm = np.asarray(jnp.transpose(wv3, (1, 2, 0)).reshape(CIN1, HD))  # swapped
    bq_all = np.asarray(bq3).reshape(HD)
    bk_all = np.asarray(bk3).reshape(HD)
    bv_perm = np.asarray(bv3).T.reshape(HD)

    wf = np.zeros((2 * CP, 4 * HD), np.float32)          # [32, 256] block-diag
    wf[:CIN1, 0:HD] = wq_all                             # q   <- xq rows
    wf[CP:CP + CIN1, HD:2 * HD] = wk_all                 # k   <- xs rows
    wf[CP:CP + CIN1, 2 * HD:3 * HD] = wv_perm            # vsw <- xs rows
    wf[CP:CP + CIN1, 3 * HD:4 * HD] = wv_perm            # vsw duplicate
    bf = np.concatenate([bq_all, bk_all, bv_perm, bv_perm]).reshape(1, 4 * HD)

    bd2 = np.repeat(np.eye(2 * H, dtype=np.float32), D, axis=0)   # [128, 16]
    bd2t = np.ascontiguousarray(bd2.T)                            # [16, 128]
    bd1 = np.repeat(np.eye(H, dtype=np.float32), D, axis=0)       # [64, 8]

    inv_ns = jnp.full((1, 1), 1.0 / abs(norm_scale), f32)
    kc_arr = jnp.full((1, 1), CURV_K, f32)

    params = (jnp.asarray(wf), jnp.asarray(bf), jnp.asarray(bd2),
              jnp.asarray(bd2t), jnp.asarray(bd1), wm, bm, inv_ns, kc_arr)

    out = jax.jit(trans_conv_layer)(xq, xs, params)
    out = jax.block_until_ready(out)

    ref = jax.vmap(lambda a, b: reference(
        a, b, wq3, bq3, wk3, bk3, wv3, bv3, wm, bm,
        jnp.float32(norm_scale), jnp.float32(CURV_K)))(xq, xs)
    np.testing.assert_allclose(np.asarray(out), np.asarray(ref),
                               rtol=1e-4, atol=1e-4)
    print("KERNEL_OK")
</pallas_src>

<mosaic_0001>
module attributes {stable_mosaic.version = 11 : i64} {
  func.func @_transconv_kernel(%arg0: i32, %arg1: memref<1x16x32xf32, #tpu.memory_space<vmem>>, %arg2: memref<32x256xf32, #tpu.memory_space<vmem>>, %arg3: memref<1x256xf32, #tpu.memory_space<vmem>>, %arg4: memref<128x16xf32, #tpu.memory_space<vmem>>, %arg5: memref<16x128xf32, #tpu.memory_space<vmem>>, %arg6: memref<64x8xf32, #tpu.memory_space<vmem>>, %arg7: memref<8x8xf32, #tpu.memory_space<vmem>>, %arg8: memref<1x8xf32, #tpu.memory_space<vmem>>, %arg9: memref<1x1xf32, #tpu.memory_space<smem>>, %arg10: memref<1x1xf32, #tpu.memory_space<smem>>, %arg11: memref<1x16x1xf32, #tpu.memory_space<vmem>>, %arg12: memref<1x16x8xf32, #tpu.memory_space<vmem>>) attributes {dimension_semantics = [#tpu.dimension_semantics<parallel>], iteration_bounds = array<i64: 8>, scalar_prefetch = 0 : i64, scratch_operands = 0 : i64, tpu.core_type = #tpu.core_type<tc>, window_params = [{transform_indices = @transform_0, window_bounds = array<i64: 1, 16, 32>}, {pipeline_mode = #tpu.pipeline_mode<synchronous>, transform_indices = @transform_1, window_bounds = array<i64: 32, 256>}, {pipeline_mode = #tpu.pipeline_mode<synchronous>, transform_indices = @transform_2, window_bounds = array<i64: 1, 256>}, {pipeline_mode = #tpu.pipeline_mode<synchronous>, transform_indices = @transform_3, window_bounds = array<i64: 128, 16>}, {pipeline_mode = #tpu.pipeline_mode<synchronous>, transform_indices = @transform_4, window_bounds = array<i64: 16, 128>}, {pipeline_mode = #tpu.pipeline_mode<synchronous>, transform_indices = @transform_5, window_bounds = array<i64: 64, 8>}, {pipeline_mode = #tpu.pipeline_mode<synchronous>, transform_indices = @transform_6, window_bounds = array<i64: 8, 8>}, {pipeline_mode = #tpu.pipeline_mode<synchronous>, transform_indices = @transform_7, window_bounds = array<i64: 1, 8>}, {transform_indices = @transform_8, window_bounds = array<i64: 1, 1>}, {transform_indices = @transform_9, window_bounds = array<i64: 1, 1>}, {transform_indices = @transform_10, window_bounds = array<i64: 1, 16, 1>}, {transform_indices = @transform_11, window_bounds = array<i64: 1, 16, 8>}]} {
    %c0 = arith.constant 0 : index
    %c0_0 = arith.constant 0 : index
    %0 = memref.load %arg9[%c0, %c0_0] : memref<1x1xf32, #tpu.memory_space<smem>>
    %c0_1 = arith.constant 0 : index
    %c0_2 = arith.constant 0 : index
    %1 = memref.load %arg10[%c0_1, %c0_2] : memref<1x1xf32, #tpu.memory_space<smem>>
    %c0_3 = arith.constant 0 : index
    %c0_4 = arith.constant 0 : index
    %c0_5 = arith.constant 0 : index
    %2 = vector.load %arg1[%c0_3, %c0_4, %c0_5] : memref<1x16x32xf32, #tpu.memory_space<vmem>>, vector<1x16x32xf32>
    %3 = vector.shape_cast %2 : vector<1x16x32xf32> to vector<16x32xf32>
    %c0_6 = arith.constant 0 : index
    %c0_7 = arith.constant 0 : index
    %4 = vector.load %arg2[%c0_6, %c0_7] : memref<32x256xf32, #tpu.memory_space<vmem>>, vector<32x256xf32>
    %cst = arith.constant dense<0.000000e+00> : vector<16x256xf32>
    %5 = tpu.matmul %3, %4, %cst {dimension_numbers = #tpu.dot_dimension_numbers<[1], [0], [0], [1], [0, 0, 1, 1], [], []>} : vector<16x32xf32>, vector<32x256xf32>, vector<16x256xf32> -> vector<16x256xf32>
    %c0_8 = arith.constant 0 : index
    %c0_9 = arith.constant 0 : index
    %6 = vector.load %arg3[%c0_8, %c0_9] : memref<1x256xf32, #tpu.memory_space<vmem>>, vector<1x256xf32>
    %7 = vector.broadcast %6 : vector<1x256xf32> to vector<16x256xf32>
    %8 = arith.addf %5, %7 : vector<16x256xf32>
    %9 = vector.extract_strided_slice %8 {offsets = [0, 0], sizes = [16, 128], strides = [1, 1]} : vector<16x256xf32> to vector<16x128xf32>
    %10 = vector.extract_strided_slice %8 {offsets = [0, 128], sizes = [16, 128], strides = [1, 1]} : vector<16x256xf32> to vector<16x128xf32>
    %11 = vector.extract_strided_slice %8 {offsets = [0, 128], sizes = [16, 64], strides = [1, 1]} : vector<16x256xf32> to vector<16x64xf32>
    %cst_10 = arith.constant 0.000000e+00 : f32
    %12 = vector.broadcast %cst_10 : f32 to vector<16x128xf32>
    %13 = arith.maximumf %9, %12 : vector<16x128xf32>
    %cst_11 = arith.constant 9.99999997E-7 : f32
    %14 = vector.broadcast %cst_11 : f32 to vector<16x128xf32>
    %15 = arith.addf %13, %14 : vector<16x128xf32>
    %16 = vector.broadcast %0 : f32 to vector<16x128xf32>
    %17 = arith.mulf %15, %16 : vector<16x128xf32>
    %18 = arith.mulf %17, %17 : vector<16x128xf32>
    %c0_12 = arith.constant 0 : index
    %c0_13 = arith.constant 0 : index
    %19 = vector.load %arg4[%c0_12, %c0_13] : memref<128x16xf32, #tpu.memory_space<vmem>>, vector<128x16xf32>
    %cst_14 = arith.constant dense<0.000000e+00> : vector<16x16xf32>
    %20 = tpu.matmul %18, %19, %cst_14 {dimension_numbers = #tpu.dot_dimension_numbers<[1], [0], [0], [1], [0, 0, 1, 1], [], []>} : vector<16x128xf32>, vector<128x16xf32>, vector<16x16xf32> -> vector<16x16xf32>
    %21 = arith.mulf %18, %18 : vector<16x128xf32>
    %c0_15 = arith.constant 0 : index
    %c0_16 = arith.constant 0 : index
    %22 = vector.load %arg4[%c0_15, %c0_16] : memref<128x16xf32, #tpu.memory_space<vmem>>, vector<128x16xf32>
    %cst_17 = arith.constant dense<0.000000e+00> : vector<16x16xf32>
    %23 = tpu.matmul %21, %22, %cst_17 {dimension_numbers = #tpu.dot_dimension_numbers<[1], [0], [0], [1], [0, 0, 1, 1], [], []>} : vector<16x128xf32>, vector<128x16xf32>, vector<16x16xf32> -> vector<16x16xf32>
    %24 = math.sqrt %20 : vector<16x16xf32>
    %25 = math.rsqrt %23 : vector<16x16xf32>
    %26 = arith.mulf %24, %25 : vector<16x16xf32>
    %c0_18 = arith.constant 0 : index
    %c0_19 = arith.constant 0 : index
    %27 = vector.load %arg5[%c0_18, %c0_19] : memref<16x128xf32, #tpu.memory_space<vmem>>, vector<16x128xf32>
    %cst_20 = arith.constant dense<0.000000e+00> : vector<16x128xf32>
    %28 = tpu.matmul %26, %27, %cst_20 {dimension_numbers = #tpu.dot_dimension_numbers<[1], [0], [0], [1], [0, 0, 1, 1], [], []>} : vector<16x16xf32>, vector<16x128xf32>, vector<16x128xf32> -> vector<16x128xf32>
    %29 = arith.mulf %28, %18 : vector<16x128xf32>
    %30 = arith.mulf %29, %10 : vector<16x128xf32>
    %cst_21 = arith.constant dense<0.000000e+00> : vector<128xf32>
    %31 = vector.multi_reduction <add>, %30, %cst_21 [0] : vector<16x128xf32> to vector<128xf32>
    %32 = vector.shape_cast %31 : vector<128xf32> to vector<1x128xf32>
    %cst_22 = arith.constant dense<0.000000e+00> : vector<128xf32>
    %33 = vector.multi_reduction <add>, %29, %cst_22 [0] : vector<16x128xf32> to vector<128xf32>
    %34 = vector.shape_cast %33 : vector<128xf32> to vector<1x128xf32>
    %35 = vector.extract_strided_slice %32 {offsets = [0, 64], sizes = [1, 64], strides = [1, 1]} : vector<1x128xf32> to vector<1x64xf32>
    %36 = vector.extract_strided_slice %34 {offsets = [0, 64], sizes = [1, 64], strides = [1, 1]} : vector<1x128xf32> to vector<1x64xf32>
    %37 = vector.extract_strided_slice %29 {offsets = [0, 0], sizes = [16, 64], strides = [1, 1]} : vector<16x128xf32> to vector<16x64xf32>
    %c0_23 = arith.constant 0 : index
    %c0_24 = arith.constant 0 : index
    %38 = vector.load %arg6[%c0_23, %c0_24] : memref<64x8xf32, #tpu.memory_space<vmem>>, vector<64x8xf32>
    %39 = vector.broadcast %35 : vector<1x64xf32> to vector<16x64xf32>
    %40 = arith.mulf %37, %39 : vector<16x64xf32>
    %cst_25 = arith.constant dense<0.000000e+00> : vector<16x8xf32>
    %41 = tpu.matmul %40, %38, %cst_25 {dimension_numbers = #tpu.dot_dimension_numbers<[1], [0], [0], [1], [0, 0, 1, 1], [], []>} : vector<16x64xf32>, vector<64x8xf32>, vector<16x8xf32> -> vector<16x8xf32>
    %42 = vector.broadcast %36 : vector<1x64xf32> to vector<16x64xf32>
    %43 = arith.mulf %37, %42 : vector<16x64xf32>
    %cst_26 = arith.constant dense<0.000000e+00> : vector<16x8xf32>
    %44 = tpu.matmul %43, %38, %cst_26 {dimension_numbers = #tpu.dot_dimension_numbers<[1], [0], [0], [1], [0, 0, 1, 1], [], []>} : vector<16x64xf32>, vector<64x8xf32>, vector<16x8xf32> -> vector<16x8xf32>
    %cst_27 = arith.constant 9.99999997E-7 : f32
    %45 = vector.broadcast %cst_27 : f32 to vector<16x8xf32>
    %46 = arith.addf %44, %45 : vector<16x8xf32>
    %47 = arith.divf %41, %46 : vector<16x8xf32>
    %cst_28 = arith.constant dense<0.000000e+00> : vector<16x8xf32>
    %48 = tpu.matmul %11, %38, %cst_28 {dimension_numbers = #tpu.dot_dimension_numbers<[1], [0], [0], [1], [0, 0, 1, 1], [], []>} : vector<16x64xf32>, vector<64x8xf32>, vector<16x8xf32> -> vector<16x8xf32>
    %cst_29 = arith.constant 1.250000e-01 : f32
    %49 = vector.broadcast %cst_29 : f32 to vector<16x8xf32>
    %50 = arith.mulf %48, %49 : vector<16x8xf32>
    %c0_30 = arith.constant 0 : index
    %c0_31 = arith.constant 0 : index
    %51 = vector.load %arg7[%c0_30, %c0_31] : memref<8x8xf32, #tpu.memory_space<vmem>>, vector<8x8xf32>
    %cst_32 = arith.constant dense<0.000000e+00> : vector<16x8xf32>
    %52 = tpu.matmul %50, %51, %cst_32 {dimension_numbers = #tpu.dot_dimension_numbers<[1], [0], [0], [1], [0, 0, 1, 1], [], []>} : vector<16x8xf32>, vector<8x8xf32>, vector<16x8xf32> -> vector<16x8xf32>
    %c0_33 = arith.constant 0 : index
    %c0_34 = arith.constant 0 : index
    %53 = vector.load %arg8[%c0_33, %c0_34] : memref<1x8xf32, #tpu.memory_space<vmem>>, vector<1x8xf32>
    %54 = vector.broadcast %53 : vector<1x8xf32> to vector<16x8xf32>
    %55 = arith.addf %52, %54 : vector<16x8xf32>
    %56 = arith.addf %47, %55 : vector<16x8xf32>
    %57 = arith.mulf %56, %56 : vector<16x8xf32>
    %cst_35 = arith.constant dense<0.000000e+00> : vector<16xf32>
    %58 = vector.multi_reduction <add>, %57, %cst_35 [1] : vector<16x8xf32> to vector<16xf32>
    %59 = vector.shape_cast %58 : vector<16xf32> to vector<16x1xf32>
    %60 = vector.broadcast %1 : f32 to vector<16x1xf32>
    %61 = arith.addf %59, %60 : vector<16x1xf32>
    %62 = math.sqrt %61 : vector<16x1xf32>
    %c0_36 = arith.constant 0 : index
    %c0_37 = arith.constant 0 : index
    %c0_38 = arith.constant 0 : index
    %63 = vector.load %arg11[%c0_36, %c0_37, %c0_38] : memref<1x16x1xf32, #tpu.memory_space<vmem>>, vector<1x16x1xf32>
    %64 = vector.shape_cast %63 : vector<1x16x1xf32> to vector<16x1xf32>
    %65 = vector.shape_cast %62 : vector<16x1xf32> to vector<1x16x1xf32>
    tpu.vector_store %arg11[%c0_36, %c0_37, %c0_38], %65 {strides = array<i32>} : memref<1x16x1xf32, #tpu.memory_space<vmem>>, vector<1x16x1xf32>,
    %c0_39 = arith.constant 0 : index
    %c0_40 = arith.constant 0 : index
    %c0_41 = arith.constant 0 : index
    %66 = vector.load %arg12[%c0_39, %c0_40, %c0_41] : memref<1x16x8xf32, #tpu.memory_space<vmem>>, vector<1x16x8xf32>
    %67 = vector.shape_cast %66 : vector<1x16x8xf32> to vector<16x8xf32>
    %68 = vector.shape_cast %56 : vector<16x8xf32> to vector<1x16x8xf32>
    tpu.vector_store %arg12[%c0_39, %c0_40, %c0_41], %68 {strides = array<i32>} : memref<1x16x8xf32, #tpu.memory_space<vmem>>, vector<1x16x8xf32>,
    return
  }
  func.func @transform_0(%arg0: i32) -> (i32, i32, i32) {
    %c0_i32 = arith.constant 0 : i32
    %c0_i32_0 = arith.constant 0 : i32
    %c0_i32_1 = arith.constant 0 : i32
    return %arg0, %c0_i32, %c0_i32_0 : i32, i32, i32
  }
  func.func @transform_1(%arg0: i32) -> (i32, i32) {
    %c0_i32 = arith.constant 0 : i32
    %c0_i32_0 = arith.constant 0 : i32
    %c0_i32_1 = arith.constant 0 : i32
    return %c0_i32, %c0_i32_0 : i32, i32
  }
  func.func @transform_2(%arg0: i32) -> (i32, i32) {
    %c0_i32 = arith.constant 0 : i32
    %c0_i32_0 = arith.constant 0 : i32
    %c0_i32_1 = arith.constant 0 : i32
    return %c0_i32, %c0_i32_0 : i32, i32
  }
  func.func @transform_3(%arg0: i32) -> (i32, i32) {
    %c0_i32 = arith.constant 0 : i32
    %c0_i32_0 = arith.constant 0 : i32
    %c0_i32_1 = arith.constant 0 : i32
    return %c0_i32, %c0_i32_0 : i32, i32
  }
  func.func @transform_4(%arg0: i32) -> (i32, i32) {
    %c0_i32 = arith.constant 0 : i32
    %c0_i32_0 = arith.constant 0 : i32
    %c0_i32_1 = arith.constant 0 : i32
    return %c0_i32, %c0_i32_0 : i32, i32
  }
  func.func @transform_5(%arg0: i32) -> (i32, i32) {
    %c0_i32 = arith.constant 0 : i32
    %c0_i32_0 = arith.constant 0 : i32
    %c0_i32_1 = arith.constant 0 : i32
    return %c0_i32, %c0_i32_0 : i32, i32
  }
  func.func @transform_6(%arg0: i32) -> (i32, i32) {
    %c0_i32 = arith.constant 0 : i32
    %c0_i32_0 = arith.constant 0 : i32
    %c0_i32_1 = arith.constant 0 : i32
    return %c0_i32, %c0_i32_0 : i32, i32
  }
  func.func @transform_7(%arg0: i32) -> (i32, i32) {
    %c0_i32 = arith.constant 0 : i32
    %c0_i32_0 = arith.constant 0 : i32
    %c0_i32_1 = arith.constant 0 : i32
    return %c0_i32, %c0_i32_0 : i32, i32
  }
  func.func @transform_8(%arg0: i32) -> (i32, i32) {
    %c0_i32 = arith.constant 0 : i32
    %c0_i32_0 = arith.constant 0 : i32
    %c0_i32_1 = arith.constant 0 : i32
    return %c0_i32, %c0_i32_0 : i32, i32
  }
  func.func @transform_9(%arg0: i32) -> (i32, i32) {
    %c0_i32 = arith.constant 0 : i32
    %c0_i32_0 = arith.constant 0 : i32
    %c0_i32_1 = arith.constant 0 : i32
    return %c0_i32, %c0_i32_0 : i32, i32
  }
  func.func @transform_10(%arg0: i32) -> (i32, i32, i32) {
    %c0_i32 = arith.constant 0 : i32
    %c0_i32_0 = arith.constant 0 : i32
    %c0_i32_1 = arith.constant 0 : i32
    return %arg0, %c0_i32, %c0_i32_0 : i32, i32, i32
  }
  func.func @transform_11(%arg0: i32) -> (i32, i32, i32) {
    %c0_i32 = arith.constant 0 : i32
    %c0_i32_0 = arith.constant 0 : i32
    %c0_i32_1 = arith.constant 0 : i32
    return %arg0, %c0_i32, %c0_i32_0 : i32, i32, i32
  }
}

</mosaic_0001>

<bundles_post_ra>
// kernel: trans_conv_layer.1
= control target key start
LH: loop header
LB: loop body
LE: loop exit
PB: predicated region body
PF: predicated region fallthrough
CT: control target
= control target key end

     0   :  { %s1754_s21 = smov 0   ;;  %s1938_s0 = inlined_call_operand.vmem [shape: f32[8,16,32], index: 0, kind: input, shape index: {}]   ;;  %s1939_s1 = inlined_call_operand.vmem [shape: f32[32,256], index: 1, kind: input, shape index: {}]   ;;  %s1940_s2 = inlined_call_operand.vmem [shape: f32[1,256], index: 2, kind: input, shape index: {}]   ;;  %s1941_s3 = inlined_call_operand.vmem [shape: f32[128,16], index: 3, kind: input, shape index: {}]   ;;  %s1942_s4 = inlined_call_operand.vmem [shape: f32[16,128], index: 4, kind: input, shape index: {}]   ;;  %s1943_s5 = inlined_call_operand.vmem [shape: f32[64,8], index: 5, kind: input, shape index: {}]   ;;  %s1944_s6 = inlined_call_operand.vmem [shape: f32[8,8], index: 6, kind: input, shape index: {}]   ;;  %s1945_s7 = inlined_call_operand.vmem [shape: f32[1,8], index: 7, kind: input, shape index: {}]   ;;  %s1946_s8 = inlined_call_operand.<no memory space> [shape: f32[1,1], index: 8, kind: input, shape index: {}]   ;;  %s1947_s9 = inlined_call_operand.<no memory space> [shape: f32[1,1], index: 9, kind: input, shape index: {}]   ;;  %s1948_s10 = inlined_call_operand.vmem [shape: f32[8,16,1], index: 10, kind: output, shape index: {0}]   ;;  %s1949_s11 = inlined_call_operand.vmem [shape: f32[8,16,8], index: 11, kind: output, shape index: {1}]  }
   0x1   :  { %17 = sst [smem:[#allocation2]] %s1946_s8 }
   0x2   :  { %18 = sst [smem:[#allocation3]] %s1947_s9 }
   0x3 LB: > { %s1287_s22 = sadd.s32 4294967295, %s1684_s21   ;;  %p1291_p0 = scmp.ge.s32.totalorder %s1684_s21, 1  ;;  %s1684_s21 = sphi %s1754_s21, %s24_s21  }
   0x4   : > { %p342_p1 = scmp.lt.s32.totalorder %s1684_s21, 9 }
   0x6   : > { %p343_p2 = pnand %p1291_p0, %p342_p1 }
   0x7   : > { %v407_v0 = vld [vmem:[%s1939_s1 + $0x8] sm:$0xff] (!%p343_p2)  ;;  %v409_v1 = vld [vmem:[%s1939_s1 + $0x18] sm:$0xff] (!%p343_p2)  ;;  %v406_v2 = vld [vmem:[%s1939_s1] sm:$0xff] (!%p343_p2)  ;;  %p387_p3 = scmp.lt.s32.totalorder (!%p343_p2), %s1287_s22, 7  ;;  %v1686_v7 = vmov (!%p343_p2), 0.0   ;;  %vm426_vm0 = vcmask (!%p343_p2), 261120   ;;  %v416_v39 = vlaneseq (!%p343_p2) }
   0x8   : > { %346 = sbr.rel (%p343_p2) target bundleno = 1441 (0x5a1), region = 60  ;;  %v1528_v3 = vpack.c.bf16 (!%p343_p2), %v409_v1, %v407_v0  ;;  %v408_v4 = vld [vmem:[%s1939_s1 + $0x10] sm:$0xff] (!%p343_p2)  ;;  %v411_v5 = vld [vmem:[%s1939_s1 + $0x28] sm:$0xff] (!%p343_p2)  ;;  %v413_v6 = vld [vmem:[%s1939_s1 + $0x38] sm:$0xff] (!%p343_p2)  ;;  %497 = vmatprep.mubr.f32.mxu0 (!%p343_p2), %v1686_v7  ;;  %s402_s17 = sld [smem:[#allocation2]] (!%p343_p2)  ;;  %vm707_vm5 = vcmask (!%p343_p2), 130048  }
   0x9   : > { %v1530_v8 = vpack.c.bf16 (!%p343_p2), %v408_v4, %v406_v2  ;;  %v1532_v9 = vpack.c.bf16 (!%p343_p2), %v413_v6, %v411_v5  ;;  %v410_v10 = vld [vmem:[%s1939_s1 + $0x20] sm:$0xff] (!%p343_p2)  ;;  %v412_v11 = vld [vmem:[%s1939_s1 + $0x30] sm:$0xff] (!%p343_p2)  ;;  %v520_v13 = vld [vmem:[%s1941_s3 + $0x8] sm:$0xff] (!%p343_p2)  ;;  %v1842_v40 = vshrl.u32 (!%p343_p2), %v416_v39, 7  ;;  %s1687_s19 = smov (!%p343_p2), 64   ;;  %vm821_vm6 = vcmask (!%p343_p2), 523264  }
   0xa   : > { %v519_v12 = vld [vmem:[%s1941_s3] sm:$0xff] (!%p343_p2)  ;;  %1529 = vmatprep.subr.bf16.mxu0 (!%p343_p2), %v1528_v3  ;;  %v521_v14 = vld [vmem:[%s1941_s3 + $0x10] sm:$0xff] (!%p343_p2)  ;;  %v522_v15 = vld [vmem:[%s1941_s3 + $0x18] sm:$0xff] (!%p343_p2)  ;;  %v1534_v16 = vpack.c.bf16 (!%p343_p2), %v412_v11, %v410_v10  ;;  %vm1085_vm7 = vcmask (!%p343_p2), 64512   ;;  %s403_s28 = sld [smem:[#allocation3]] (!%p343_p2)  ;;  %vm1194_vm8 = vcmask (!%p343_p2), 7168  }
   0xb   : > { %1531 = vmatpush1.bf16.msra.mxu0 (!%p343_p2), %v1530_v8  ;;  %v1536_v17 = vpack.c.bf16 (!%p343_p2), %v520_v13, %v519_v12  ;;  %v1540_v18 = vpack.c.bf16 (!%p343_p2), %v522_v15, %v521_v14  ;;  %v523_v19 = vld [vmem:[%s1941_s3 + $0x20] sm:$0xff] (!%p343_p2)  ;;  %v524_v20 = vld [vmem:[%s1941_s3 + $0x28] sm:$0xff] (!%p343_p2)  ;;  %v525_v23 = vld [vmem:[%s1941_s3 + $0x30] sm:$0xff] (!%p343_p2)  ;;  %v418_v41 = vsub.s32 (!%p343_p2), 0, %v1842_v40 }
   0xc   : > { %1533 = vmatprep.subr.bf16.mxu0 (!%p343_p2), %v1532_v9  ;;  %v1544_v22 = vpack.c.bf16 (!%p343_p2), %v524_v20, %v523_v19  ;;  %v526_v24 = vld [vmem:[%s1941_s3 + $0x38] sm:$0xff] (!%p343_p2)  ;;  %v527_v27 = vld [vmem:[%s1941_s3 + $0x40] sm:$0xff] (!%p343_p2)  ;;  %v528_v28 = vld [vmem:[%s1941_s3 + $0x48] sm:$0xff] (!%p343_p2) }
   0xd   : > { %1537 = vmatprep.subr.bf16.mxu1 (!%p343_p2), %v1536_v17  ;;  %v1548_v26 = vpack.c.bf16 (!%p343_p2), %v526_v24, %v525_v23  ;;  %v1552_v29 = vpack.c.bf16 (!%p343_p2), %v528_v28, %v527_v27  ;;  %v529_v30 = vld [vmem:[%s1941_s3 + $0x50] sm:$0xff] (!%p343_p2)  ;;  %v530_v31 = vld [vmem:[%s1941_s3 + $0x58] sm:$0xff] (!%p343_p2)  ;;  %v531_v33 = vld [vmem:[%s1941_s3 + $0x60] sm:$0xff] (!%p343_p2) }
   0xe   : > { %1539 = vmatpush3.bf16.msra.mxu1 (!%p343_p2), %v1536_v17  ;;  %v1556_v32 = vpack.c.bf16 (!%p343_p2), %v530_v31, %v529_v30  ;;  %v532_v34 = vld [vmem:[%s1941_s3 + $0x68] sm:$0xff] (!%p343_p2)  ;;  %v533_v36 = vld [vmem:[%s1941_s3 + $0x70] sm:$0xff] (!%p343_p2)  ;;  %v534_v37 = vld [vmem:[%s1941_s3 + $0x78] sm:$0xff] (!%p343_p2)  ;;  %v514_v48 = vstv (!%p343_p2), %s402_s17  ;;  %v422_v30 = vsub.s32 (!%p343_p2), 1, %v1842_v40 }
   0xf   : > { %s1951_s22 = smov (!%p387_p3, %s1287_s22), 7  ;;  %1535 = vmatpush1.bf16.msra.mxu0 %v1534_v16  ;;  %1541 = vmatprep.subr.bf16.mxu1 %v1540_v18  ;;  %v1560_v35 = vpack.c.bf16 %v532_v34, %v531_v33  ;;  %v1564_v38 = vpack.c.bf16 %v534_v37, %v533_v36  ;;  %v1848_v42 = vld [vmem:[%s1940_s2] sm:$0x3]  ;;  %v706_v62 = vld [vmem:[%s1942_s4 + $0x8] sm:$0xff]  ;;  %v809_v20 = vld [vmem:[%s1943_s5 + $0x10] sm:$0xff] }
  0x10   : > { %s1798_s26 = sshll.u32 %s1951_s22, 4  ;;  %1569 = vmatprep.subr.bf16.mxu0 %v1536_v17  ;;  %v419_v43 = vrot.slane %v1848_v42, %v418_v41  ;;  %v705_v61 = vld [vmem:[%s1942_s4] sm:$0xff]  ;;  %v808_v19 = vld [vmem:[%s1943_s5 + $0x8] sm:$0xff]  ;;  %v813_v27 = vld [vmem:[%s1943_s5 + $0x30] sm:$0xff]  ;;  %v423_v31 = vrot.slane %v1848_v42, %v422_v30 }
  0x11   : > { %s391_s29 = scalar_lea.vmem %s1938_s0, %s1798_s26  ;;  %v1600_v63 = vpack.c.bf16 %v706_v62, %v705_v61  ;;  %v811_v24 = vld [vmem:[%s1943_s5 + $0x20] sm:$0xff]  ;;  %v814_v28 = vld [vmem:[%s1943_s5 + $0x38] sm:$0xff]  ;;  %s401_s27 = scalar_lea.vmem %s1949_s11, %s1798_s26 }
  0x12   : > { %v404_v21 = vld [vmem:[%s391_s29] sm:$0xff]  ;;  %1543 = vmatpush3.bf16.msra.mxu1 %v1540_v18  ;;  %v405_v25 = vld [vmem:[%s391_s29 + $0x8] sm:$0xff]  ;;  %s396_s12 = scalar_lea.vmem %s1948_s10, %s1798_s26 }
  0x13   : > { %1298 = vmatmul.mubr.msk.f32.vlgmr.msra.gmra.mrb[0].mxu0 %vm426_vm0, %v404_v21  ;;  %1545 = vmatprep.subr.bf16.mxu1 %v1544_v22 }
  0x14   : > { %503 = vmatprep.mubr.f32.mxu0 %v1686_v7  ;;  %1571 = vmatpush3.bf16.msra.mxu0 %v1536_v17 }
  0x15   : > { %1573 = vmatprep.subr.bf16.mxu0 %v1540_v18 }
  0x16   : > { %1547 = vmatpush3.bf16.msra.mxu1 %v1544_v22 }
  0x17   : > { %1299 = vmatmul.mubr.msk.f32.gmra.mrb[2].mxu0 %vm426_vm0, %v405_v25  ;;  %1549 = vmatprep.subr.bf16.mxu1 %v1548_v26  ;;  %v812_v25 = vld [vmem:[%s1943_s5 + $0x28] sm:$0xff] }
  0x18   : > { %1575 = vmatpush3.bf16.msra.mxu0 %v1540_v18  ;;  %v807_v18 = vld [vmem:[%s1943_s5] sm:$0xff] }
  0x19   : > { %1577 = vmatprep.subr.bf16.mxu0 %v1544_v22  ;;  %v1604_v21 = vpack.c.bf16 %v808_v19, %v807_v18 }
  0x1a   : > { %1551 = vmatpush3.bf16.msra.mxu1 %v1548_v26 }
  0x1b   : > { %1553 = vmatprep.subr.bf16.mxu1 %v1552_v29 }
  0x1c   : > { %1579 = vmatpush3.bf16.msra.mxu0 %v1544_v22  ;;  %v810_v22 = vld [vmem:[%s1943_s5 + $0x18] sm:$0xff] }
  0x1d   : > { %1581 = vmatprep.subr.bf16.mxu0 %v1548_v26  ;;  %v1883_v23 = vpack.c.bf16 %v810_v22, %v809_v20  ;;  %v1177_v22 = vstv %s403_s28 }
  0x1e   : > { %1555 = vmatpush3.bf16.msra.mxu1 %v1552_v29 }
  0x1f   : > { %1557 = vmatprep.subr.bf16.mxu1 %v1556_v32 }
  0x20   : > { %1583 = vmatpush3.bf16.msra.mxu0 %v1548_v26  ;;  %v1612_v26 = vpack.c.bf16 %v812_v25, %v811_v24 }
  0x21   : > { %1585 = vmatprep.subr.bf16.mxu0 %v1552_v29 }
  0x22   : > { %1559 = vmatpush3.bf16.msra.mxu1 %v1556_v32 }
  0x23   : > { %1561 = vmatprep.subr.bf16.mxu1 %v1560_v35 }
  0x24   : > { %1587 = vmatpush3.bf16.msra.mxu0 %v1552_v29  ;;  %v1616_v29 = vpack.c.bf16 %v814_v28, %v813_v27 }
  0x25   : > { %1589 = vmatprep.subr.bf16.mxu0 %v1556_v32 }
  0x26   : > { %1563 = vmatpush3.bf16.msra.mxu1 %v1560_v35 }
  0x27   : > { %1565 = vmatprep.subr.bf16.mxu1 %v1564_v38 }
  0x28   : > { %1591 = vmatpush3.bf16.msra.mxu0 %v1556_v32 }
  0x29   : > { %1593 = vmatprep.subr.bf16.mxu0 %v1560_v35 }
  0x2a   : > { %1567 = vmatpush3.bf16.msra.mxu1 %v1564_v38 }
  0x2b   : > { %1605 = vmatprep.subr.bf16.mxu1 %v1604_v21 }
  0x2c   : > { %1595 = vmatpush3.bf16.msra.mxu0 %v1560_v35 }
  0x2d   : > { %1597 = vmatprep.subr.bf16.mxu0 %v1564_v38 }
  0x30   : > { %1599 = vmatpush3.bf16.msra.mxu0 %v1564_v38 }
  0x31   : > { %1601 = vmatprep.subr.bf16.mxu0 %v1600_v63 }
  0xe6   : > { %v499_v44 = vpop.f32.mrb[0].mxu0 }
  0xe7   : > { %v500_v45 = vadd.f32 %v499_v44, %v419_v43  ;;  %v1851_v46 = vpop.f32.mrb[1].mxu0 }
  0xe8   : > { %v502_v36 = vadd.f32 %v1851_v46, %v423_v31 }
  0xe9   : > { %v510_v47 = vmax.f32 %v500_v45, 0.0 }
  0xea   : > { %v505_v49 = vpop.f32.mrb[2].mxu0 }
  0xeb   : > { %v512_v50 = vadd.f32 1e-06, %v510_v47  ;;  %v506_v51 = vadd.f32 %v505_v49, %v419_v43  ;;  %v1853_v52 = vpop.f32.mrb[3].mxu0 }
  0xec   : > { %v508_v33 = vadd.f32 %v1853_v52, %v423_v31 }
  0xed   : > { %v515_v53 = vmul.f32 %v514_v48, %v512_v50  ;;  %v511_v54 = vmax.f32 %v506_v51, 0.0 }
  0xef   : > { %v513_v55 = vadd.f32 1e-06, %v511_v54  ;;  %v1855_v56 = vmul.f32 %v515_v53, %v515_v53 }
  0xf1   : > { %v516_v57 = vmul.f32 %v514_v48, %v513_v55  ;;  %1421 = vmatprep.mubr.f32.mxu1 %v1855_v56  ;;  %v610_v58 = vmul.f32 %v1855_v56, %v1855_v56 }
  0xf3   : > { %1456 = vmatprep.mubr.f32.mxu0 %v610_v58  ;;  %v1860_v59 = vmul.f32 %v516_v57, %v516_v57 }
  0xf5   : > { %1422 = vmatmul.mubr.f32.vlgmr.msra.gmra.mrb[0].mxu1 %v1860_v59  ;;  %v611_v60 = vmul.f32 %v1860_v59, %v1860_v59 }
  0xf6   : > { %1607 = vmatpush3.bf16.msra.mxu1 %v1604_v21 }
  0xf7   : > { %1457 = vmatmul.mubr.f32.vlgmr.msra.gmra.mrb[4].mxu0 %v611_v60  ;;  %1609 = vmatprep.subr.bf16.mxu1 %v1883_v23  ;;  %v1077_v60 = vld [vmem:[%s1944_s6] sm:$0xff] }
  0xf8   : > { %1603 = vmatpush3.bf16.msra.mxu0 %v1600_v63 }
  0xf9   : > { %1621 = vmatprep.subr.bf16.mxu0 %v1604_v21 }
  0xfa   : > { %1611 = vmatpush3.bf16.msra.mxu1 %v1883_v23 }
  0xfb   : > { %1613 = vmatprep.subr.bf16.mxu1 %v1612_v26 }
  0xfe   : > { %1615 = vmatpush3.bf16.msra.mxu1 %v1612_v26 }
  0xff   : > { %1617 = vmatprep.subr.bf16.mxu1 %v1616_v29 }
 0x102   : > { %1619 = vmatpush3.bf16.msra.mxu1 %v1616_v29 }
 0x103   : > { %1637 = vmatprep.subr.bf16.mxu1 %v1604_v21 }
 0x1c8   : > { %v1423_v0 = vpop.f32.mrb[0].mxu1 }
 0x1c9   : > { %1662 = vrsqrt.f32 %v1423_v0  ;;  %v601_v1 = vpop.f32.mrb[1].mxu1  ;;  %vm696_vm1 = vcmp.eq.f32.partialorder %v1423_v0, inf  ;;  %v699_v7 = vand.u32 2147483648, %v1423_v0  ;;  %vm698_vm2 = vcmp.eq.f32.partialorder %v1423_v0, 0.0 }
 0x1ca   : > { %1664 = vrsqrt.f32 %v601_v1  ;;  %v1458_v2 = vpop.f32.mrb[4].mxu0  ;;  %vm689_vm3 = vcmp.eq.f32.partialorder %v601_v1, inf  ;;  %v692_v10 = vand.u32 2147483648, %v601_v1  ;;  %vm691_vm4 = vcmp.eq.f32.partialorder %v601_v1, 0.0 }
 0x1cb   : > { %v678_v3 = vpop.f32.mrb[5].mxu0  ;;  %1666 = vrsqrt.f32 %v1458_v2 }
 0x1cc   : > { %1668 = vrsqrt.f32 %v678_v3 }
 0x1d3   : > { %v1663_v4 = vpop.eup %1662 }
 0x1d4   : > { %v1665_v5 = vpop.eup %1664  ;;  %v695_v6 = vmul.f32 %v1663_v4, %v1423_v0 }
 0x1d5   : > { %v688_v8 = vmul.f32 %v1665_v5, %v601_v1  ;;  %v1667_v11 = vpop.eup %1666 }
 0x1d6   : > { %v697_v9 = vsel %vm696_vm1, %v1423_v0, %v695_v6  ;;  %v1669_v14 = vpop.eup %1668 }
 0x1d7   : > { %v700_v12 = vsel %vm698_vm2, %v699_v7, %v697_v9  ;;  %v690_v13 = vsel %vm689_vm3, %v601_v1, %v688_v8 }
 0x1d8   : > { %v704_v15 = vmul.f32 %v1667_v11, %v700_v12  ;;  %v693_v16 = vsel %vm691_vm4, %v692_v10, %v690_v13  ;;  %v1308_v11 = vld [vmem:[%s1945_s7] ss:$0 sm:$0xff] }
 0x1d9   : > { %v703_v17 = vmul.f32 %v1669_v14, %v693_v16 }
 0x1db   : > { %1463 = vmatprep.mubr.msk.f32.mxu0 %vm707_vm5, %v703_v17 }
 0x1dc   : > { %1464 = vmatmul.mubr.msk.f32.vlgmr.msra.gmra.mrb[6].mxu0 %vm707_vm5, %v704_v15 }
 0x1dd   : > { %1623 = vmatpush3.bf16.msra.mxu0 %v1604_v21 }
 0x1de   : > { %1625 = vmatprep.subr.bf16.mxu0 %v1883_v23 }
 0x1e1   : > { %1627 = vmatpush3.bf16.msra.mxu0 %v1883_v23 }
 0x1e2   : > { %1629 = vmatprep.subr.bf16.mxu0 %v1612_v26 }
 0x1e5   : > { %1631 = vmatpush3.bf16.msra.mxu0 %v1612_v26 }
 0x1e6   : > { %1633 = vmatprep.subr.bf16.mxu0 %v1616_v29 }
 0x1e9   : > { %1635 = vmatpush3.bf16.msra.mxu0 %v1616_v29 }
 0x1ea   : > { %1523 = vmatprep.subr.mxu0 %v1077_v60 }
 0x2af   : > { %v1465_v32 = vpop.f32.mrb[6].mxu0 }
 0x2b0   : > { %v790_v34 = vmul.f32 %v1465_v32, %v1860_v59  ;;  %v780_v35 = vpop.f32.mrb[7].mxu0 }
 0x2b1   : > { %v789_v37 = vmul.f32 %v780_v35, %v1855_v56 }
 0x2b2   : > { %v792_v38 = vmul.f32 %v790_v34, %v508_v33 }
 0x2b3   : > { %v791_v39 = vmul.f32 %v789_v37, %v502_v36  ;;  %v800_v41 = vadd.f32 %v790_v34, %v789_v37 }
 0x2b5   : > { %v793_v43 = vadd.f32 %v792_v38, %v791_v39  ;;  %v801_v44 = vrot.slane %v800_v41, 4 }
 0x2b7   : > { %v794_v45 = vrot.slane %v793_v43, 4  ;;  %v802_v47 = vadd.f32 %v801_v44, %v800_v41 }
 0x2b9   : > { %v795_v40 = vadd.f32 %v794_v45, %v793_v43  ;;  %v803_v48 = vrot.slane %v802_v47, 2 }
 0x2bb   : > { %v796_v42 = vrot.slane %v795_v40, 2  ;;  %v804_v50 = vadd.f32 %v803_v48, %v802_v47 }
 0x2bd   : > { %v797_v49 = vadd.f32 %v796_v42, %v795_v40  ;;  %v805_v53 = vrot.slane %v804_v50, 1 }
 0x2bf   : > { %v798_v51 = vrot.slane %v797_v49, 1  ;;  %v806_v46 = vadd.f32 %v805_v53, %v804_v50 }
 0x2c1   : > { %v799_v52 = vadd.f32 %v798_v51, %v797_v49 }
 0x2c3   : > { %816 = vrot.lane.b32.xlu0 %v799_v52, %s1687_s19 }
 0x2c7   : > { %904 = vrot.lane.b32.xlu0 %v806_v46, %s1687_s19 }
 0x335   : > { %v817_v54 = vpop.permute.xlu0 %816 }
 0x336   : > { %v819_v55 = vmul.f32 %v817_v54, %v789_v37  ;;  %v820_v56 = vmul.f32 %v817_v54, %v790_v34 }
 0x338   : > { %1482 = vmatprep.mubr.msk.f32.mxu1 %vm821_vm6, %v819_v55 }
 0x339   : > { %1483 = vmatmul.mubr.msk.f32.vlgmr.msra.gmra.mrb[2].mxu1 %vm821_vm6, %v820_v56  ;;  %v905_v57 = vpop.permute.xlu0 %904 }
 0x33a   : > { %1639 = vmatpush3.bf16.msra.mxu1 %v1604_v21  ;;  %v907_v58 = vmul.f32 %v905_v57, %v789_v37  ;;  %v908_v59 = vmul.f32 %v905_v57, %v790_v34  ;;  %1520 = vmatprep.mubr.msk.f32.mxu1 %vm821_vm6, %v502_v36 }
 0x33b   : > { %1641 = vmatprep.subr.bf16.mxu1 %v1883_v23 }
 0x33c   : > { %1501 = vmatprep.mubr.msk.f32.mxu0 %vm821_vm6, %v907_v58 }
 0x33d   : > { %1502 = vmatmul.mubr.msk.f32.vlgmr.msra.gmra.mrb[8].mxu0 %vm821_vm6, %v908_v59 }
 0x33e   : > { %1643 = vmatpush3.bf16.msra.mxu1 %v1883_v23  ;;  %1524 = vmatpush3.msra.mxu0 %v1077_v60 }
 0x33f   : > { %1645 = vmatprep.subr.bf16.mxu1 %v1612_v26 }
 0x342   : > { %1647 = vmatpush3.bf16.msra.mxu1 %v1612_v26 }
 0x343   : > { %1649 = vmatprep.subr.bf16.mxu1 %v1616_v29 }
 0x346   : > { %1651 = vmatpush3.bf16.msra.mxu1 %v1616_v29 }
 0x349   : > { %1521 = vmatmul.mubr.msk.f32.vlgmr.msra.gmra.mrb[4].mxu1 %vm821_vm6, %v508_v33 }
 0x40c   : > { %v1484_v61 = vpop.f32.mrb[2].mxu1 }
 0x40d   : > { %v894_v62 = vpop.f32.mrb[3].mxu1 }
 0x410   : > { %v1503_v63 = vpop.f32.mrb[8].mxu0 }
 0x411   : > { %v987_v0 = vadd.f32 1e-06, %v1503_v63  ;;  %v981_v1 = vpop.f32.mrb[9].mxu0 }
 0x412   : > { %v982_v2 = vadd.f32 1e-06, %v981_v1 }
 0x413   : > { %1670 = vrcp.f32 %v987_v0 }
 0x414   : > { %1672 = vrcp.f32 %v982_v2 }
 0x41c   : > { %v1522_v3 = vpop.f32.mrb[4].mxu1 }
 0x41d   : > { %v1671_v4 = vpop.eup %1670  ;;  %v1066_v5 = vpop.f32.mrb[5].mxu1  ;;  %v1076_v9 = vmul.f32 0.125, %v1522_v3 }
 0x41e   : > { %v1673_v6 = vpop.eup %1672  ;;  %v1075_v7 = vmul.f32 0.125, %v1066_v5  ;;  %v993_v8 = vmul.f32 %v1671_v4, %v1484_v61 }
 0x41f   : > { %v991_v10 = vmul.f32 %v1673_v6, %v894_v62 }
 0x420   : > { %1525 = vmatprep.mubr.msk.f32.mxu0 %vm1085_vm7, %v1075_v7 }
 0x421   : > { %1526 = vmatmul.mubr.msk.f32.vlgmr.msra.gmra.mrb[10].mxu0 %vm1085_vm7, %v1076_v9 }
 0x4f4   : > { %v1527_v12 = vpop.f32.mrb[10].mxu0 }
 0x4f5   : > { %v1164_v13 = vadd.f32 %v1527_v12, %v1308_v11  ;;  %v1158_v14 = vpop.f32.mrb[11].mxu0 }
 0x4f6   : > { %v1159_v15 = vadd.f32 %v1308_v11, %v1158_v14 }
 0x4f7   : > { %v1168_v16 = vadd.f32 %v1164_v13, %v993_v8 }
 0x4f8   : > { %v1167_v17 = vadd.f32 %v1159_v15, %v991_v10 }
 0x4f9   : > { %1198 = vst.msk [vmem:[%s401_s27 + $0x8] sm:$0xff] %vm1085_vm7, %v1168_v16  ;;  %v1170_v20 = vmul.f32 %v1168_v16, %v1168_v16 }
 0x4fa   : > { %1197 = vst.msk [vmem:[%s401_s27] sm:$0xff] %vm1085_vm7, %v1167_v17  ;;  %v1169_v18 = vmul.f32 %v1167_v17, %v1167_v17 }
 0x4fb   : > { %v1174_v21 = vsel %vm1085_vm7, %v1170_v20, 0.0 }
 0x4fc   : > { %v1171_v19 = vsel %vm1085_vm7, %v1169_v18, 0.0 }
 0x4fd   : > { %1172 = vadd.xlane.f32.xlu1 %v1171_v19 }
 0x501   : > { %1175 = vadd.xlane.f32.xlu1 %v1174_v21 }
 0x58a   : > { %v1173_v23 = vpop.xlane.xlu1 %1172 }
 0x58b   : > { %v1178_v24 = vadd.f32 %v1177_v22, %v1173_v23 }
 0x58d   : > { %1674 = vrsqrt.f32 %v1178_v24  ;;  %vm1182_vm9 = vcmp.eq.f32.partialorder %v1178_v24, inf  ;;  %v1185_v29 = vand.u32 2147483648, %v1178_v24  ;;  %vm1184_vm10 = vcmp.eq.f32.partialorder %v1178_v24, 0.0 }
 0x58e   : > { %v1176_v25 = vpop.xlane.xlu1 %1175 }
 0x58f   : > { %v1179_v26 = vadd.f32 %v1177_v22, %v1176_v25 }
 0x591   : > { %1676 = vrsqrt.f32 %v1179_v26  ;;  %vm1189_vm11 = vcmp.eq.f32.partialorder %v1179_v26, inf  ;;  %v1192_v34 = vand.u32 2147483648, %v1179_v26  ;;  %vm1191_vm12 = vcmp.eq.f32.partialorder %v1179_v26, 0.0 }
 0x597   : > { %v1675_v27 = vpop.eup %1674 }
 0x598   : > { %v1181_v28 = vmul.f32 %v1675_v27, %v1178_v24 }
 0x59a   : > { %v1183_v30 = vsel %vm1182_vm9, %v1178_v24, %v1181_v28 }
 0x59b   : > { %v1677_v31 = vpop.eup %1676  ;;  %v1186_v32 = vsel %vm1184_vm10, %v1185_v29, %v1183_v30 }
 0x59c   : > { %1195 = vst.msk [vmem:[%s396_s12] sm:$0xff] %vm1194_vm8, %v1186_v32  ;;  %v1188_v33 = vmul.f32 %v1677_v31, %v1179_v26 }
 0x59e   : > { %v1190_v35 = vsel %vm1189_vm11, %v1179_v26, %v1188_v33 }
 0x59f   : > { %v1193_v36 = vsel %vm1191_vm12, %v1192_v34, %v1190_v35 }
 0x5a0   : > { %1196 = vst.msk [vmem:[%s396_s12 + $0x8] sm:$0xff] %vm1194_vm8, %v1193_v36 }
 0x5a1 PF: > { %s24_s21 = sadd.s32 1, %s1684_s21  }
 0x5a2   : > { %p21_p4 = scmp.ge.s32.totalorder %s24_s21, 10  }
 0x5a4   :  { %23 = sbr.rel (!%p21_p4) target bundleno = 3 (0x3), region = 102 }

</bundles_post_ra>
